<compile_context>
chip_gen: v7x
topology: tpu7x:2x2x1
jax: 0.10.0
libtpu: 0.0.40
codegen_flags: <defaults>
</compile_context>

<pallas_src>
import functools

import jax
import jax.numpy as jnp
from jax import lax
from jax.experimental import pallas as pl
from jax.experimental.pallas import tpu as pltpu

_LANE = 128  # TPU vreg lane width


def _patches_3x3(xp_ref, H, W, pad, w_idx):
    """Build the (9*C, H*W) im2col patch matrix for a 3x3 SAME conv.

    xp_ref : (C, 2*pad + H*W) VMEM scratch holding [zero halo | image | zero halo]
             with the image stored flat (row-major h,w) starting at lane `pad`.
    w_idx  : (1, H*W) int32 lane coordinate w = q % W (for column masking).
    Rows are tap-major, channel-minor: row (kh*3 + kw)*C + c.
    """
    HW = H * W
    slabs = []
    for kh in range(3):
        for kw in range(3):
            dh, dw = kh - 1, kw - 1
            start = pad + dh * W + dw
            slab = xp_ref[:, start:start + HW]        # (C, HW) shifted window read
            # Zero the columns that wrapped across the image's W boundary;
            # row (h) overflow already reads zeros from the halos.
            if dw < 0:
                slab = jnp.where(w_idx >= -dw, slab, 0.0)
            elif dw > 0:
                slab = jnp.where(w_idx < W - dw, slab, 0.0)
            slabs.append(slab)
    return jnp.concatenate(slabs, axis=0)             # (9*C, HW)


def _feature_kernel(x_ref, w1_ref, b1_ref, w2_ref, b2_ref, o_ref, xp_ref,
                    *, H, W, pad):
    """Fused conv3x3+ReLU -> conv3x3+ReLU, whole batch in one invocation.

    x_ref : (B, C, H*W)   channel-padded input images (NCHW, spatial flattened)
    w*_ref: (Cout, 9*Cin) im2col-flattened weights
    b*_ref: (Cout, 1)     biases (broadcast over lanes)
    o_ref : (B, Cout, H*W) features in NCHW-flat order (flatten is free)
    xp_ref: (C, 2*pad + H*W) zero-halo scratch for in-kernel SAME padding
    """
    HW = H * W
    B = x_ref.shape[0]

    # Lane coordinate w = q % W, shared by every im2col build.
    w_idx = lax.broadcasted_iota(jnp.int32, (1, HW), 1) % W

    # Zero the halo scratch once; only the middle window is ever overwritten.
    xp_ref[...] = jnp.zeros_like(xp_ref)

    def conv_relu(get_img, w_t, bias):
        # One batched im2col + ONE MXU matmul for the whole batch.
        cols = []
        for b in range(B):                                   # B is tiny & static
            xp_ref[:, pad:pad + HW] = get_img(b)             # place image in halo buf
            cols.append(_patches_3x3(xp_ref, H, W, pad, w_idx))
        patches = jnp.concatenate(cols, axis=1)              # (9*C, B*HW)
        acc = jnp.dot(w_t, patches, preferred_element_type=jnp.float32)
        return jnp.maximum(acc + bias, 0.0)                  # (Cout, B*HW), lane-dense

    mid = conv_relu(lambda b: x_ref[b], w1_ref[...], b1_ref[...])
    out = conv_relu(lambda b: mid[:, b * HW:(b + 1) * HW], w2_ref[...], b2_ref[...])

    # Fully dense (Cout, HW) stores per image == NCHW layout, flatten is a
    # plain row-major reshape outside.
    for b in range(B):
        o_ref[b] = out[:, b * HW:(b + 1) * HW].astype(o_ref.dtype)


def feature_extractor_forward(x_nchw, params):
    """FeatureExtractor forward: conv1 -> relu -> conv2 -> relu -> flatten.

    x_nchw: (B, C, H, W) (PyTorch NCHW).  Returns (B, Cout*H*W) features in
    exactly the ordering torch.nn.Flatten() would produce.
    """
    w1, b1, w2, b2 = params
    B, Cin, H, W = x_nchw.shape
    Cmid = w1.shape[-1]
    Cout = w2.shape[-1]
    HW = H * W
    assert w1.shape[:2] == (3, 3) and w2.shape[:2] == (3, 3)

    # Zero halo width: >= W+1 and lane-aligned so the image store is aligned.
    pad = ((W + 1 + _LANE - 1) // _LANE) * _LANE

    # Pad input channels up to the sublane tile (8) so every in-kernel slab /
    # concat / scratch store is (8,128)-tile aligned.  Matching weight rows
    # are zero, so the result is exact.
    Cp = ((Cin + 7) // 8) * 8
    assert Cmid % 8 == 0 and Cp == Cmid, "script assumes padded Cin == Cmid == 8"

    x_flat = x_nchw.reshape(B, Cin, HW)
    if Cp != Cin:
        x_flat = jnp.pad(x_flat, ((0, 0), (0, Cp - Cin), (0, 0)))
        w1 = jnp.pad(w1, ((0, 0), (0, 0), (0, Cp - Cin), (0, 0)))

    # Weights -> 2-D (Cout, 9*Cin) slabs, tap-major / channel-minor, matching
    # the im2col row order.  Biases as (Cout, 1) columns (lane broadcast).
    w1_t = jnp.transpose(w1, (3, 0, 1, 2)).reshape(Cmid, 9 * Cp)
    w2_t = jnp.transpose(w2, (3, 0, 1, 2)).reshape(Cout, 9 * Cmid)
    b1_c = b1.reshape(Cmid, 1)
    b2_c = b2.reshape(Cout, 1)

    out = pl.pallas_call(
        functools.partial(_feature_kernel, H=H, W=W, pad=pad),
        out_shape=jax.ShapeDtypeStruct((B, Cout, HW), x_nchw.dtype),
        scratch_shapes=[pltpu.VMEM((Cp, HW + 2 * pad), jnp.float32)],
    )(x_flat, w1_t, b1_c, w2_t, b2_c)

    # (B, Cout, H*W) row-major == torch.nn.Flatten() of NCHW features.
    return out.reshape(B, Cout * HW)


def _reference_forward(x_nchw, params):
    """Pure-JAX reference (lax.conv) for correctness checking."""
    w1, b1, w2, b2 = params

    def conv(x, w, b):
        w_oihw = jnp.transpose(w, (3, 2, 0, 1))   # HWIO -> OIHW
        y = lax.conv_general_dilated(
            x, w_oihw, window_strides=(1, 1), padding="SAME",
            dimension_numbers=("NCHW", "OIHW", "NCHW"))
        return jnp.maximum(y + b[None, :, None, None], 0.0)

    y = conv(x_nchw, w1, b1)
    y = conv(y, w2, b2)
    return y.reshape(y.shape[0], -1)


if __name__ == "__main__":
    # Small deterministic shapes: B=2, Cin=4, H=W=16, Cmid=8, Cout=16.
    B, Cin, H, W = 2, 4, 16, 16
    Cmid, Cout = 8, 16

    key = jax.random.PRNGKey(0)
    k_x, k_w1, k_b1, k_w2, k_b2 = jax.random.split(key, 5)

    x = jax.random.normal(k_x, (B, Cin, H, W), dtype=jnp.float32)
    w1 = jax.random.normal(k_w1, (3, 3, Cin, Cmid), jnp.float32) * (1.0 / (3 * 3 * Cin)) ** 0.5
    b1 = jax.random.normal(k_b1, (Cmid,), jnp.float32) * 0.01
    w2 = jax.random.normal(k_w2, (3, 3, Cmid, Cout), jnp.float32) * (1.0 / (3 * 3 * Cmid)) ** 0.5
    b2 = jax.random.normal(k_b2, (Cout,), jnp.float32) * 0.01
    params = (w1, b1, w2, b2)

    out = jax.jit(feature_extractor_forward)(x, params)
    out = jax.block_until_ready(out)

    ref = _reference_forward(x, params)
    assert out.shape == (B, Cout * H * W), out.shape
    assert jnp.allclose(out, ref, atol=1e-3, rtol=1e-3), (
        float(jnp.max(jnp.abs(out - ref))))

    print("KERNEL_OK")
</pallas_src>

<mosaic_0001>
module attributes {stable_mosaic.version = 11 : i64} {
  func.func @_feature_kernel(%arg0: memref<2x8x256xf32, #tpu.memory_space<vmem>>, %arg1: memref<8x72xf32, #tpu.memory_space<vmem>>, %arg2: memref<8x1xf32, #tpu.memory_space<vmem>>, %arg3: memref<16x72xf32, #tpu.memory_space<vmem>>, %arg4: memref<16x1xf32, #tpu.memory_space<vmem>>, %arg5: memref<2x16x256xf32, #tpu.memory_space<vmem>>, %arg6: memref<8x512xf32, #tpu.memory_space<vmem>>) attributes {dimension_semantics = [], scalar_prefetch = 0 : i64, scratch_operands = 1 : i64, tpu.core_type = #tpu.core_type<tc>} {
    %0 = tpu.iota {dimensions = array<i32: 1>} : vector<1x256xi32>
    %c16_i32 = arith.constant 16 : i32
    %c0_i32 = arith.constant 0 : i32
    %1 = arith.cmpi eq, %c16_i32, %c0_i32 : i32
    %c1_i32 = arith.constant 1 : i32
    %2 = arith.select %1, %c1_i32, %c16_i32 : i32
    %3 = vector.broadcast %2 : i32 to vector<1x256xi32>
    %4 = arith.remsi %0, %3 : vector<1x256xi32>
    %c0_i32_0 = arith.constant 0 : i32
    %5 = vector.broadcast %c0_i32_0 : i32 to vector<1x256xi32>
    %6 = arith.cmpi ne, %4, %5 : vector<1x256xi32>
    %c0_i32_1 = arith.constant 0 : i32
    %7 = vector.broadcast %c0_i32_1 : i32 to vector<1x256xi32>
    %8 = arith.cmpi slt, %4, %7 : vector<1x256xi32>
    %c0_i32_2 = arith.constant 0 : i32
    %9 = arith.cmpi slt, %2, %c0_i32_2 : i32
    %10 = vector.broadcast %9 : i1 to vector<1x256xi1>
    %11 = vector.broadcast %10 : vector<1x256xi1> to vector<1x256xi1>
    %12 = arith.xori %8, %11 : vector<1x256xi1>
    %13 = arith.andi %12, %6 : vector<1x256xi1>
    %14 = vector.broadcast %2 : i32 to vector<1x256xi32>
    %15 = arith.addi %4, %14 : vector<1x256xi32>
    %16 = arith.select %13, %15, %4 : vector<1x256xi1>, vector<1x256xi32>
    %cst = arith.constant 0.000000e+00 : f32
    %17 = vector.broadcast %cst : f32 to vector<8x512xf32>
    %c0 = arith.constant 0 : index
    %c0_3 = arith.constant 0 : index
    %18 = vector.load %arg6[%c0, %c0_3] : memref<8x512xf32, #tpu.memory_space<vmem>>, vector<8x512xf32>
    tpu.vector_store %arg6[%c0, %c0_3], %17 {strides = array<i32>} : memref<8x512xf32, #tpu.memory_space<vmem>>, vector<8x512xf32>,
    %c0_4 = arith.constant 0 : index
    %c0_5 = arith.constant 0 : index
    %19 = vector.load %arg1[%c0_4, %c0_5] : memref<8x72xf32, #tpu.memory_space<vmem>>, vector<8x72xf32>
    %c0_6 = arith.constant 0 : index
    %c0_7 = arith.constant 0 : index
    %20 = vector.load %arg2[%c0_6, %c0_7] : memref<8x1xf32, #tpu.memory_space<vmem>>, vector<8x1xf32>
    %c0_8 = arith.constant 0 : index
    %c0_9 = arith.constant 0 : index
    %c0_10 = arith.constant 0 : index
    %21 = vector.load %arg0[%c0_8, %c0_9, %c0_10] : memref<2x8x256xf32, #tpu.memory_space<vmem>>, vector<1x8x256xf32>
    %22 = vector.shape_cast %21 : vector<1x8x256xf32> to vector<8x256xf32>
    %c0_11 = arith.constant 0 : index
    %c128 = arith.constant 128 : index
    %23 = vector.load %arg6[%c0_11, %c128] : memref<8x512xf32, #tpu.memory_space<vmem>>, vector<8x256xf32>
    tpu.vector_store %arg6[%c0_11, %c128], %22 {strides = array<i32>} : memref<8x512xf32, #tpu.memory_space<vmem>>, vector<8x256xf32>,
    %c0_12 = arith.constant 0 : index
    %c111 = arith.constant 111 : index
    %24 = vector.load %arg6[%c0_12, %c111] : memref<8x512xf32, #tpu.memory_space<vmem>>, vector<8x256xf32>
    %c1_i32_13 = arith.constant 1 : i32
    %25 = vector.broadcast %c1_i32_13 : i32 to vector<1x256xi32>
    %26 = arith.cmpi sge, %16, %25 : vector<1x256xi32>
    %cst_14 = arith.constant 0.000000e+00 : f32
    %27 = vector.shape_cast %26 : vector<1x256xi1> to vector<1x256xi1>
    %28 = vector.broadcast %27 : vector<1x256xi1> to vector<8x256xi1>
    %29 = vector.broadcast %cst_14 : f32 to vector<8x256xf32>
    %30 = arith.select %28, %24, %29 : vector<8x256xi1>, vector<8x256xf32>
    %c0_15 = arith.constant 0 : index
    %c112 = arith.constant 112 : index
    %31 = vector.load %arg6[%c0_15, %c112] : memref<8x512xf32, #tpu.memory_space<vmem>>, vector<8x256xf32>
    %c0_16 = arith.constant 0 : index
    %c113 = arith.constant 113 : index
    %32 = vector.load %arg6[%c0_16, %c113] : memref<8x512xf32, #tpu.memory_space<vmem>>, vector<8x256xf32>
    %c15_i32 = arith.constant 15 : i32
    %33 = vector.broadcast %c15_i32 : i32 to vector<1x256xi32>
    %34 = arith.cmpi slt, %16, %33 : vector<1x256xi32>
    %cst_17 = arith.constant 0.000000e+00 : f32
    %35 = vector.shape_cast %34 : vector<1x256xi1> to vector<1x256xi1>
    %36 = vector.broadcast %35 : vector<1x256xi1> to vector<8x256xi1>
    %37 = vector.broadcast %cst_17 : f32 to vector<8x256xf32>
    %38 = arith.select %36, %32, %37 : vector<8x256xi1>, vector<8x256xf32>
    %c0_18 = arith.constant 0 : index
    %c127 = arith.constant 127 : index
    %39 = vector.load %arg6[%c0_18, %c127] : memref<8x512xf32, #tpu.memory_space<vmem>>, vector<8x256xf32>
    %c1_i32_19 = arith.constant 1 : i32
    %40 = vector.broadcast %c1_i32_19 : i32 to vector<1x256xi32>
    %41 = arith.cmpi sge, %16, %40 : vector<1x256xi32>
    %cst_20 = arith.constant 0.000000e+00 : f32
    %42 = vector.shape_cast %41 : vector<1x256xi1> to vector<1x256xi1>
    %43 = vector.broadcast %42 : vector<1x256xi1> to vector<8x256xi1>
    %44 = vector.broadcast %cst_20 : f32 to vector<8x256xf32>
    %45 = arith.select %43, %39, %44 : vector<8x256xi1>, vector<8x256xf32>
    %c0_21 = arith.constant 0 : index
    %c128_22 = arith.constant 128 : index
    %46 = vector.load %arg6[%c0_21, %c128_22] : memref<8x512xf32, #tpu.memory_space<vmem>>, vector<8x256xf32>
    %c0_23 = arith.constant 0 : index
    %c129 = arith.constant 129 : index
    %47 = vector.load %arg6[%c0_23, %c129] : memref<8x512xf32, #tpu.memory_space<vmem>>, vector<8x256xf32>
    %c15_i32_24 = arith.constant 15 : i32
    %48 = vector.broadcast %c15_i32_24 : i32 to vector<1x256xi32>
    %49 = arith.cmpi slt, %16, %48 : vector<1x256xi32>
    %cst_25 = arith.constant 0.000000e+00 : f32
    %50 = vector.shape_cast %49 : vector<1x256xi1> to vector<1x256xi1>
    %51 = vector.broadcast %50 : vector<1x256xi1> to vector<8x256xi1>
    %52 = vector.broadcast %cst_25 : f32 to vector<8x256xf32>
    %53 = arith.select %51, %47, %52 : vector<8x256xi1>, vector<8x256xf32>
    %c0_26 = arith.constant 0 : index
    %c143 = arith.constant 143 : index
    %54 = vector.load %arg6[%c0_26, %c143] : memref<8x512xf32, #tpu.memory_space<vmem>>, vector<8x256xf32>
    %c1_i32_27 = arith.constant 1 : i32
    %55 = vector.broadcast %c1_i32_27 : i32 to vector<1x256xi32>
    %56 = arith.cmpi sge, %16, %55 : vector<1x256xi32>
    %cst_28 = arith.constant 0.000000e+00 : f32
    %57 = vector.shape_cast %56 : vector<1x256xi1> to vector<1x256xi1>
    %58 = vector.broadcast %57 : vector<1x256xi1> to vector<8x256xi1>
    %59 = vector.broadcast %cst_28 : f32 to vector<8x256xf32>
    %60 = arith.select %58, %54, %59 : vector<8x256xi1>, vector<8x256xf32>
    %c0_29 = arith.constant 0 : index
    %c144 = arith.constant 144 : index
    %61 = vector.load %arg6[%c0_29, %c144] : memref<8x512xf32, #tpu.memory_space<vmem>>, vector<8x256xf32>
    %c0_30 = arith.constant 0 : index
    %c145 = arith.constant 145 : index
    %62 = vector.load %arg6[%c0_30, %c145] : memref<8x512xf32, #tpu.memory_space<vmem>>, vector<8x256xf32>
    %c15_i32_31 = arith.constant 15 : i32
    %63 = vector.broadcast %c15_i32_31 : i32 to vector<1x256xi32>
    %64 = arith.cmpi slt, %16, %63 : vector<1x256xi32>
    %cst_32 = arith.constant 0.000000e+00 : f32
    %65 = vector.shape_cast %64 : vector<1x256xi1> to vector<1x256xi1>
    %66 = vector.broadcast %65 : vector<1x256xi1> to vector<8x256xi1>
    %67 = vector.broadcast %cst_32 : f32 to vector<8x256xf32>
    %68 = arith.select %66, %62, %67 : vector<8x256xi1>, vector<8x256xf32>
    %69 = tpu.concatenate %30, %31, %38, %45, %46, %53, %60, %61, %68 in 0 : vector<8x256xf32>, vector<8x256xf32>, vector<8x256xf32>, vector<8x256xf32>, vector<8x256xf32>, vector<8x256xf32>, vector<8x256xf32>, vector<8x256xf32>, vector<8x256xf32> -> vector<72x256xf32>
    %c1 = arith.constant 1 : index
    %c0_33 = arith.constant 0 : index
    %c0_34 = arith.constant 0 : index
    %70 = vector.load %arg0[%c1, %c0_33, %c0_34] : memref<2x8x256xf32, #tpu.memory_space<vmem>>, vector<1x8x256xf32>
    %71 = vector.shape_cast %70 : vector<1x8x256xf32> to vector<8x256xf32>
    %c0_35 = arith.constant 0 : index
    %c128_36 = arith.constant 128 : index
    %72 = vector.load %arg6[%c0_35, %c128_36] : memref<8x512xf32, #tpu.memory_space<vmem>>, vector<8x256xf32>
    tpu.vector_store %arg6[%c0_35, %c128_36], %71 {strides = array<i32>} : memref<8x512xf32, #tpu.memory_space<vmem>>, vector<8x256xf32>,
    %c0_37 = arith.constant 0 : index
    %c111_38 = arith.constant 111 : index
    %73 = vector.load %arg6[%c0_37, %c111_38] : memref<8x512xf32, #tpu.memory_space<vmem>>, vector<8x256xf32>
    %c1_i32_39 = arith.constant 1 : i32
    %74 = vector.broadcast %c1_i32_39 : i32 to vector<1x256xi32>
    %75 = arith.cmpi sge, %16, %74 : vector<1x256xi32>
    %cst_40 = arith.constant 0.000000e+00 : f32
    %76 = vector.shape_cast %75 : vector<1x256xi1> to vector<1x256xi1>
    %77 = vector.broadcast %76 : vector<1x256xi1> to vector<8x256xi1>
    %78 = vector.broadcast %cst_40 : f32 to vector<8x256xf32>
    %79 = arith.select %77, %73, %78 : vector<8x256xi1>, vector<8x256xf32>
    %c0_41 = arith.constant 0 : index
    %c112_42 = arith.constant 112 : index
    %80 = vector.load %arg6[%c0_41, %c112_42] : memref<8x512xf32, #tpu.memory_space<vmem>>, vector<8x256xf32>
    %c0_43 = arith.constant 0 : index
    %c113_44 = arith.constant 113 : index
    %81 = vector.load %arg6[%c0_43, %c113_44] : memref<8x512xf32, #tpu.memory_space<vmem>>, vector<8x256xf32>
    %c15_i32_45 = arith.constant 15 : i32
    %82 = vector.broadcast %c15_i32_45 : i32 to vector<1x256xi32>
    %83 = arith.cmpi slt, %16, %82 : vector<1x256xi32>
    %cst_46 = arith.constant 0.000000e+00 : f32
    %84 = vector.shape_cast %83 : vector<1x256xi1> to vector<1x256xi1>
    %85 = vector.broadcast %84 : vector<1x256xi1> to vector<8x256xi1>
    %86 = vector.broadcast %cst_46 : f32 to vector<8x256xf32>
    %87 = arith.select %85, %81, %86 : vector<8x256xi1>, vector<8x256xf32>
    %c0_47 = arith.constant 0 : index
    %c127_48 = arith.constant 127 : index
    %88 = vector.load %arg6[%c0_47, %c127_48] : memref<8x512xf32, #tpu.memory_space<vmem>>, vector<8x256xf32>
    %c1_i32_49 = arith.constant 1 : i32
    %89 = vector.broadcast %c1_i32_49 : i32 to vector<1x256xi32>
    %90 = arith.cmpi sge, %16, %89 : vector<1x256xi32>
    %cst_50 = arith.constant 0.000000e+00 : f32
    %91 = vector.shape_cast %90 : vector<1x256xi1> to vector<1x256xi1>
    %92 = vector.broadcast %91 : vector<1x256xi1> to vector<8x256xi1>
    %93 = vector.broadcast %cst_50 : f32 to vector<8x256xf32>
    %94 = arith.select %92, %88, %93 : vector<8x256xi1>, vector<8x256xf32>
    %c0_51 = arith.constant 0 : index
    %c128_52 = arith.constant 128 : index
    %95 = vector.load %arg6[%c0_51, %c128_52] : memref<8x512xf32, #tpu.memory_space<vmem>>, vector<8x256xf32>
    %c0_53 = arith.constant 0 : index
    %c129_54 = arith.constant 129 : index
    %96 = vector.load %arg6[%c0_53, %c129_54] : memref<8x512xf32, #tpu.memory_space<vmem>>, vector<8x256xf32>
    %c15_i32_55 = arith.constant 15 : i32
    %97 = vector.broadcast %c15_i32_55 : i32 to vector<1x256xi32>
    %98 = arith.cmpi slt, %16, %97 : vector<1x256xi32>
    %cst_56 = arith.constant 0.000000e+00 : f32
    %99 = vector.shape_cast %98 : vector<1x256xi1> to vector<1x256xi1>
    %100 = vector.broadcast %99 : vector<1x256xi1> to vector<8x256xi1>
    %101 = vector.broadcast %cst_56 : f32 to vector<8x256xf32>
    %102 = arith.select %100, %96, %101 : vector<8x256xi1>, vector<8x256xf32>
    %c0_57 = arith.constant 0 : index
    %c143_58 = arith.constant 143 : index
    %103 = vector.load %arg6[%c0_57, %c143_58] : memref<8x512xf32, #tpu.memory_space<vmem>>, vector<8x256xf32>
    %c1_i32_59 = arith.constant 1 : i32
    %104 = vector.broadcast %c1_i32_59 : i32 to vector<1x256xi32>
    %105 = arith.cmpi sge, %16, %104 : vector<1x256xi32>
    %cst_60 = arith.constant 0.000000e+00 : f32
    %106 = vector.shape_cast %105 : vector<1x256xi1> to vector<1x256xi1>
    %107 = vector.broadcast %106 : vector<1x256xi1> to vector<8x256xi1>
    %108 = vector.broadcast %cst_60 : f32 to vector<8x256xf32>
    %109 = arith.select %107, %103, %108 : vector<8x256xi1>, vector<8x256xf32>
    %c0_61 = arith.constant 0 : index
    %c144_62 = arith.constant 144 : index
    %110 = vector.load %arg6[%c0_61, %c144_62] : memref<8x512xf32, #tpu.memory_space<vmem>>, vector<8x256xf32>
    %c0_63 = arith.constant 0 : index
    %c145_64 = arith.constant 145 : index
    %111 = vector.load %arg6[%c0_63, %c145_64] : memref<8x512xf32, #tpu.memory_space<vmem>>, vector<8x256xf32>
    %c15_i32_65 = arith.constant 15 : i32
    %112 = vector.broadcast %c15_i32_65 : i32 to vector<1x256xi32>
    %113 = arith.cmpi slt, %16, %112 : vector<1x256xi32>
    %cst_66 = arith.constant 0.000000e+00 : f32
    %114 = vector.shape_cast %113 : vector<1x256xi1> to vector<1x256xi1>
    %115 = vector.broadcast %114 : vector<1x256xi1> to vector<8x256xi1>
    %116 = vector.broadcast %cst_66 : f32 to vector<8x256xf32>
    %117 = arith.select %115, %111, %116 : vector<8x256xi1>, vector<8x256xf32>
    %118 = tpu.concatenate %79, %80, %87, %94, %95, %102, %109, %110, %117 in 0 : vector<8x256xf32>, vector<8x256xf32>, vector<8x256xf32>, vector<8x256xf32>, vector<8x256xf32>, vector<8x256xf32>, vector<8x256xf32>, vector<8x256xf32>, vector<8x256xf32> -> vector<72x256xf32>
    %119 = tpu.concatenate %69, %118 in 1 : vector<72x256xf32>, vector<72x256xf32> -> vector<72x512xf32>
    %cst_67 = arith.constant dense<0.000000e+00> : vector<8x512xf32>
    %120 = tpu.matmul %19, %119, %cst_67 {dimension_numbers = #tpu.dot_dimension_numbers<[1], [0], [0], [1], [0, 0, 1, 1], [], []>} : vector<8x72xf32>, vector<72x512xf32>, vector<8x512xf32> -> vector<8x512xf32>
    %121 = vector.broadcast %20 : vector<8x1xf32> to vector<8x512xf32>
    %122 = arith.addf %120, %121 : vector<8x512xf32>
    %cst_68 = arith.constant 0.000000e+00 : f32
    %123 = vector.broadcast %cst_68 : f32 to vector<8x512xf32>
    %124 = arith.maximumf %122, %123 : vector<8x512xf32>
    %c0_69 = arith.constant 0 : index
    %c0_70 = arith.constant 0 : index
    %125 = vector.load %arg3[%c0_69, %c0_70] : memref<16x72xf32, #tpu.memory_space<vmem>>, vector<16x72xf32>
    %c0_71 = arith.constant 0 : index
    %c0_72 = arith.constant 0 : index
    %126 = vector.load %arg4[%c0_71, %c0_72] : memref<16x1xf32, #tpu.memory_space<vmem>>, vector<16x1xf32>
    %127 = vector.extract_strided_slice %124 {offsets = [0, 0], sizes = [8, 256], strides = [1, 1]} : vector<8x512xf32> to vector<8x256xf32>
    %c0_73 = arith.constant 0 : index
    %c128_74 = arith.constant 128 : index
    %128 = vector.load %arg6[%c0_73, %c128_74] : memref<8x512xf32, #tpu.memory_space<vmem>>, vector<8x256xf32>
    tpu.vector_store %arg6[%c0_73, %c128_74], %127 {strides = array<i32>} : memref<8x512xf32, #tpu.memory_space<vmem>>, vector<8x256xf32>,
    %c0_75 = arith.constant 0 : index
    %c111_76 = arith.constant 111 : index
    %129 = vector.load %arg6[%c0_75, %c111_76] : memref<8x512xf32, #tpu.memory_space<vmem>>, vector<8x256xf32>
    %c1_i32_77 = arith.constant 1 : i32
    %130 = vector.broadcast %c1_i32_77 : i32 to vector<1x256xi32>
    %131 = arith.cmpi sge, %16, %130 : vector<1x256xi32>
    %cst_78 = arith.constant 0.000000e+00 : f32
    %132 = vector.shape_cast %131 : vector<1x256xi1> to vector<1x256xi1>
    %133 = vector.broadcast %132 : vector<1x256xi1> to vector<8x256xi1>
    %134 = vector.broadcast %cst_78 : f32 to vector<8x256xf32>
    %135 = arith.select %133, %129, %134 : vector<8x256xi1>, vector<8x256xf32>
    %c0_79 = arith.constant 0 : index
    %c112_80 = arith.constant 112 : index
    %136 = vector.load %arg6[%c0_79, %c112_80] : memref<8x512xf32, #tpu.memory_space<vmem>>, vector<8x256xf32>
    %c0_81 = arith.constant 0 : index
    %c113_82 = arith.constant 113 : index
    %137 = vector.load %arg6[%c0_81, %c113_82] : memref<8x512xf32, #tpu.memory_space<vmem>>, vector<8x256xf32>
    %c15_i32_83 = arith.constant 15 : i32
    %138 = vector.broadcast %c15_i32_83 : i32 to vector<1x256xi32>
    %139 = arith.cmpi slt, %16, %138 : vector<1x256xi32>
    %cst_84 = arith.constant 0.000000e+00 : f32
    %140 = vector.shape_cast %139 : vector<1x256xi1> to vector<1x256xi1>
    %141 = vector.broadcast %140 : vector<1x256xi1> to vector<8x256xi1>
    %142 = vector.broadcast %cst_84 : f32 to vector<8x256xf32>
    %143 = arith.select %141, %137, %142 : vector<8x256xi1>, vector<8x256xf32>
    %c0_85 = arith.constant 0 : index
    %c127_86 = arith.constant 127 : index
    %144 = vector.load %arg6[%c0_85, %c127_86] : memref<8x512xf32, #tpu.memory_space<vmem>>, vector<8x256xf32>
    %c1_i32_87 = arith.constant 1 : i32
    %145 = vector.broadcast %c1_i32_87 : i32 to vector<1x256xi32>
    %146 = arith.cmpi sge, %16, %145 : vector<1x256xi32>
    %cst_88 = arith.constant 0.000000e+00 : f32
    %147 = vector.shape_cast %146 : vector<1x256xi1> to vector<1x256xi1>
    %148 = vector.broadcast %147 : vector<1x256xi1> to vector<8x256xi1>
    %149 = vector.broadcast %cst_88 : f32 to vector<8x256xf32>
    %150 = arith.select %148, %144, %149 : vector<8x256xi1>, vector<8x256xf32>
    %c0_89 = arith.constant 0 : index
    %c128_90 = arith.constant 128 : index
    %151 = vector.load %arg6[%c0_89, %c128_90] : memref<8x512xf32, #tpu.memory_space<vmem>>, vector<8x256xf32>
    %c0_91 = arith.constant 0 : index
    %c129_92 = arith.constant 129 : index
    %152 = vector.load %arg6[%c0_91, %c129_92] : memref<8x512xf32, #tpu.memory_space<vmem>>, vector<8x256xf32>
    %c15_i32_93 = arith.constant 15 : i32
    %153 = vector.broadcast %c15_i32_93 : i32 to vector<1x256xi32>
    %154 = arith.cmpi slt, %16, %153 : vector<1x256xi32>
    %cst_94 = arith.constant 0.000000e+00 : f32
    %155 = vector.shape_cast %154 : vector<1x256xi1> to vector<1x256xi1>
    %156 = vector.broadcast %155 : vector<1x256xi1> to vector<8x256xi1>
    %157 = vector.broadcast %cst_94 : f32 to vector<8x256xf32>
    %158 = arith.select %156, %152, %157 : vector<8x256xi1>, vector<8x256xf32>
    %c0_95 = arith.constant 0 : index
    %c143_96 = arith.constant 143 : index
    %159 = vector.load %arg6[%c0_95, %c143_96] : memref<8x512xf32, #tpu.memory_space<vmem>>, vector<8x256xf32>
    %c1_i32_97 = arith.constant 1 : i32
    %160 = vector.broadcast %c1_i32_97 : i32 to vector<1x256xi32>
    %161 = arith.cmpi sge, %16, %160 : vector<1x256xi32>
    %cst_98 = arith.constant 0.000000e+00 : f32
    %162 = vector.shape_cast %161 : vector<1x256xi1> to vector<1x256xi1>
    %163 = vector.broadcast %162 : vector<1x256xi1> to vector<8x256xi1>
    %164 = vector.broadcast %cst_98 : f32 to vector<8x256xf32>
    %165 = arith.select %163, %159, %164 : vector<8x256xi1>, vector<8x256xf32>
    %c0_99 = arith.constant 0 : index
    %c144_100 = arith.constant 144 : index
    %166 = vector.load %arg6[%c0_99, %c144_100] : memref<8x512xf32, #tpu.memory_space<vmem>>, vector<8x256xf32>
    %c0_101 = arith.constant 0 : index
    %c145_102 = arith.constant 145 : index
    %167 = vector.load %arg6[%c0_101, %c145_102] : memref<8x512xf32, #tpu.memory_space<vmem>>, vector<8x256xf32>
    %c15_i32_103 = arith.constant 15 : i32
    %168 = vector.broadcast %c15_i32_103 : i32 to vector<1x256xi32>
    %169 = arith.cmpi slt, %16, %168 : vector<1x256xi32>
    %cst_104 = arith.constant 0.000000e+00 : f32
    %170 = vector.shape_cast %169 : vector<1x256xi1> to vector<1x256xi1>
    %171 = vector.broadcast %170 : vector<1x256xi1> to vector<8x256xi1>
    %172 = vector.broadcast %cst_104 : f32 to vector<8x256xf32>
    %173 = arith.select %171, %167, %172 : vector<8x256xi1>, vector<8x256xf32>
    %174 = tpu.concatenate %135, %136, %143, %150, %151, %158, %165, %166, %173 in 0 : vector<8x256xf32>, vector<8x256xf32>, vector<8x256xf32>, vector<8x256xf32>, vector<8x256xf32>, vector<8x256xf32>, vector<8x256xf32>, vector<8x256xf32>, vector<8x256xf32> -> vector<72x256xf32>
    %175 = vector.extract_strided_slice %124 {offsets = [0, 256], sizes = [8, 256], strides = [1, 1]} : vector<8x512xf32> to vector<8x256xf32>
    %c0_105 = arith.constant 0 : index
    %c128_106 = arith.constant 128 : index
    %176 = vector.load %arg6[%c0_105, %c128_106] : memref<8x512xf32, #tpu.memory_space<vmem>>, vector<8x256xf32>
    tpu.vector_store %arg6[%c0_105, %c128_106], %175 {strides = array<i32>} : memref<8x512xf32, #tpu.memory_space<vmem>>, vector<8x256xf32>,
    %c0_107 = arith.constant 0 : index
    %c111_108 = arith.constant 111 : index
    %177 = vector.load %arg6[%c0_107, %c111_108] : memref<8x512xf32, #tpu.memory_space<vmem>>, vector<8x256xf32>
    %c1_i32_109 = arith.constant 1 : i32
    %178 = vector.broadcast %c1_i32_109 : i32 to vector<1x256xi32>
    %179 = arith.cmpi sge, %16, %178 : vector<1x256xi32>
    %cst_110 = arith.constant 0.000000e+00 : f32
    %180 = vector.shape_cast %179 : vector<1x256xi1> to vector<1x256xi1>
    %181 = vector.broadcast %180 : vector<1x256xi1> to vector<8x256xi1>
    %182 = vector.broadcast %cst_110 : f32 to vector<8x256xf32>
    %183 = arith.select %181, %177, %182 : vector<8x256xi1>, vector<8x256xf32>
    %c0_111 = arith.constant 0 : index
    %c112_112 = arith.constant 112 : index
    %184 = vector.load %arg6[%c0_111, %c112_112] : memref<8x512xf32, #tpu.memory_space<vmem>>, vector<8x256xf32>
    %c0_113 = arith.constant 0 : index
    %c113_114 = arith.constant 113 : index
    %185 = vector.load %arg6[%c0_113, %c113_114] : memref<8x512xf32, #tpu.memory_space<vmem>>, vector<8x256xf32>
    %c15_i32_115 = arith.constant 15 : i32
    %186 = vector.broadcast %c15_i32_115 : i32 to vector<1x256xi32>
    %187 = arith.cmpi slt, %16, %186 : vector<1x256xi32>
    %cst_116 = arith.constant 0.000000e+00 : f32
    %188 = vector.shape_cast %187 : vector<1x256xi1> to vector<1x256xi1>
    %189 = vector.broadcast %188 : vector<1x256xi1> to vector<8x256xi1>
    %190 = vector.broadcast %cst_116 : f32 to vector<8x256xf32>
    %191 = arith.select %189, %185, %190 : vector<8x256xi1>, vector<8x256xf32>
    %c0_117 = arith.constant 0 : index
    %c127_118 = arith.constant 127 : index
    %192 = vector.load %arg6[%c0_117, %c127_118] : memref<8x512xf32, #tpu.memory_space<vmem>>, vector<8x256xf32>
    %c1_i32_119 = arith.constant 1 : i32
    %193 = vector.broadcast %c1_i32_119 : i32 to vector<1x256xi32>
    %194 = arith.cmpi sge, %16, %193 : vector<1x256xi32>
    %cst_120 = arith.constant 0.000000e+00 : f32
    %195 = vector.shape_cast %194 : vector<1x256xi1> to vector<1x256xi1>
    %196 = vector.broadcast %195 : vector<1x256xi1> to vector<8x256xi1>
    %197 = vector.broadcast %cst_120 : f32 to vector<8x256xf32>
    %198 = arith.select %196, %192, %197 : vector<8x256xi1>, vector<8x256xf32>
    %c0_121 = arith.constant 0 : index
    %c128_122 = arith.constant 128 : index
    %199 = vector.load %arg6[%c0_121, %c128_122] : memref<8x512xf32, #tpu.memory_space<vmem>>, vector<8x256xf32>
    %c0_123 = arith.constant 0 : index
    %c129_124 = arith.constant 129 : index
    %200 = vector.load %arg6[%c0_123, %c129_124] : memref<8x512xf32, #tpu.memory_space<vmem>>, vector<8x256xf32>
    %c15_i32_125 = arith.constant 15 : i32
    %201 = vector.broadcast %c15_i32_125 : i32 to vector<1x256xi32>
    %202 = arith.cmpi slt, %16, %201 : vector<1x256xi32>
    %cst_126 = arith.constant 0.000000e+00 : f32
    %203 = vector.shape_cast %202 : vector<1x256xi1> to vector<1x256xi1>
    %204 = vector.broadcast %203 : vector<1x256xi1> to vector<8x256xi1>
    %205 = vector.broadcast %cst_126 : f32 to vector<8x256xf32>
    %206 = arith.select %204, %200, %205 : vector<8x256xi1>, vector<8x256xf32>
    %c0_127 = arith.constant 0 : index
    %c143_128 = arith.constant 143 : index
    %207 = vector.load %arg6[%c0_127, %c143_128] : memref<8x512xf32, #tpu.memory_space<vmem>>, vector<8x256xf32>
    %c1_i32_129 = arith.constant 1 : i32
    %208 = vector.broadcast %c1_i32_129 : i32 to vector<1x256xi32>
    %209 = arith.cmpi sge, %16, %208 : vector<1x256xi32>
    %cst_130 = arith.constant 0.000000e+00 : f32
    %210 = vector.shape_cast %209 : vector<1x256xi1> to vector<1x256xi1>
    %211 = vector.broadcast %210 : vector<1x256xi1> to vector<8x256xi1>
    %212 = vector.broadcast %cst_130 : f32 to vector<8x256xf32>
    %213 = arith.select %211, %207, %212 : vector<8x256xi1>, vector<8x256xf32>
    %c0_131 = arith.constant 0 : index
    %c144_132 = arith.constant 144 : index
    %214 = vector.load %arg6[%c0_131, %c144_132] : memref<8x512xf32, #tpu.memory_space<vmem>>, vector<8x256xf32>
    %c0_133 = arith.constant 0 : index
    %c145_134 = arith.constant 145 : index
    %215 = vector.load %arg6[%c0_133, %c145_134] : memref<8x512xf32, #tpu.memory_space<vmem>>, vector<8x256xf32>
    %c15_i32_135 = arith.constant 15 : i32
    %216 = vector.broadcast %c15_i32_135 : i32 to vector<1x256xi32>
    %217 = arith.cmpi slt, %16, %216 : vector<1x256xi32>
    %cst_136 = arith.constant 0.000000e+00 : f32
    %218 = vector.shape_cast %217 : vector<1x256xi1> to vector<1x256xi1>
    %219 = vector.broadcast %218 : vector<1x256xi1> to vector<8x256xi1>
    %220 = vector.broadcast %cst_136 : f32 to vector<8x256xf32>
    %221 = arith.select %219, %215, %220 : vector<8x256xi1>, vector<8x256xf32>
    %222 = tpu.concatenate %183, %184, %191, %198, %199, %206, %213, %214, %221 in 0 : vector<8x256xf32>, vector<8x256xf32>, vector<8x256xf32>, vector<8x256xf32>, vector<8x256xf32>, vector<8x256xf32>, vector<8x256xf32>, vector<8x256xf32>, vector<8x256xf32> -> vector<72x256xf32>
    %223 = tpu.concatenate %174, %222 in 1 : vector<72x256xf32>, vector<72x256xf32> -> vector<72x512xf32>
    %cst_137 = arith.constant dense<0.000000e+00> : vector<16x512xf32>
    %224 = tpu.matmul %125, %223, %cst_137 {dimension_numbers = #tpu.dot_dimension_numbers<[1], [0], [0], [1], [0, 0, 1, 1], [], []>} : vector<16x72xf32>, vector<72x512xf32>, vector<16x512xf32> -> vector<16x512xf32>
    %225 = vector.broadcast %126 : vector<16x1xf32> to vector<16x512xf32>
    %226 = arith.addf %224, %225 : vector<16x512xf32>
    %cst_138 = arith.constant 0.000000e+00 : f32
    %227 = vector.broadcast %cst_138 : f32 to vector<16x512xf32>
    %228 = arith.maximumf %226, %227 : vector<16x512xf32>
    %229 = vector.extract_strided_slice %228 {offsets = [0, 0], sizes = [16, 256], strides = [1, 1]} : vector<16x512xf32> to vector<16x256xf32>
    %c0_139 = arith.constant 0 : index
    %c0_140 = arith.constant 0 : index
    %c0_141 = arith.constant 0 : index
    %230 = vector.load %arg5[%c0_139, %c0_140, %c0_141] : memref<2x16x256xf32, #tpu.memory_space<vmem>>, vector<1x16x256xf32>
    %231 = vector.shape_cast %230 : vector<1x16x256xf32> to vector<16x256xf32>
    %232 = vector.shape_cast %229 : vector<16x256xf32> to vector<1x16x256xf32>
    tpu.vector_store %arg5[%c0_139, %c0_140, %c0_141], %232 {strides = array<i32>} : memref<2x16x256xf32, #tpu.memory_space<vmem>>, vector<1x16x256xf32>,
    %233 = vector.extract_strided_slice %228 {offsets = [0, 256], sizes = [16, 256], strides = [1, 1]} : vector<16x512xf32> to vector<16x256xf32>
    %c1_142 = arith.constant 1 : index
    %c0_143 = arith.constant 0 : index
    %c0_144 = arith.constant 0 : index
    %234 = vector.load %arg5[%c1_142, %c0_143, %c0_144] : memref<2x16x256xf32, #tpu.memory_space<vmem>>, vector<1x16x256xf32>
    %235 = vector.shape_cast %234 : vector<1x16x256xf32> to vector<16x256xf32>
    %236 = vector.shape_cast %233 : vector<16x256xf32> to vector<1x16x256xf32>
    tpu.vector_store %arg5[%c1_142, %c0_143, %c0_144], %236 {strides = array<i32>} : memref<2x16x256xf32, #tpu.memory_space<vmem>>, vector<1x16x256xf32>,
    return
  }
}

</mosaic_0001>

<bundles_post_ra>
// kernel: feature_extractor_forward.1
= control target key start
LH: loop header
LB: loop body
LE: loop exit
PB: predicated region body
PF: predicated region fallthrough
CT: control target
= control target key end

     0   :  { %v1241_v3 = vmov 0.0   ;;  %s1242_s26 = smov 17   ;;  %s1243_s27 = smov 16   ;;  %v1249_v10 = vmov 0   ;;  %v20_v12 = vlaneseq  ;;  %vm75_vm0 = vcmask 138240   ;;  %s1690_s0 = inlined_call_operand.vmem [shape: f32[2,8,256], index: 0, kind: input, shape index: {}]   ;;  %s1691_s2 = inlined_call_operand.vmem [shape: f32[8,1], index: 2, kind: input, shape index: {}]   ;;  %s1692_s1 = inlined_call_operand.vmem [shape: f32[8,72], index: 1, kind: input, shape index: {}]   ;;  %s1693_s4 = inlined_call_operand.vmem [shape: f32[16,1], index: 4, kind: input, shape index: {}]   ;;  %s1694_s3 = inlined_call_operand.vmem [shape: f32[16,72], index: 3, kind: input, shape index: {}]   ;;  %s1695_s5 = inlined_call_operand.vmem [shape: f32[2,16,256], index: 5, kind: output, shape index: {}]  }
   0x1   :  { %v1285_v0 = vld [vmem:[%s1690_s0 + $0x10] sm:$0xff]  ;;  %v1290_v1 = vld [vmem:[%s1690_s0 + $0x18] sm:$0xff]  ;;  %v1295_v2 = vld [vmem:[%s1690_s0] sm:$0xff]  ;;  %363 = vmatprep.mubr.f32.mxu0 %v1241_v3  ;;  %434 = vmatprep.mubr.f32.mxu1 %v1241_v3  ;;  %s1245_s28 = smov 15   ;;  %s1246_s29 = smov 127   ;;  %vm165_vm1 = vcmask 130048  }
   0x2   :  { %v1029_v4 = vpack.i.bf16 %v1290_v1, %v1285_v0  ;;  %v1303_v5 = vld [vmem:[%s1690_s0 + $0x8] sm:$0xff]  ;;  %s1244_s0 = smov 1   ;;  %v1084_v7 = vpack.i.bf16 %v1241_v3, %v1290_v1  ;;  %v1089_v9 = vpack.i.bf16 %v1285_v0, %v1295_v2  ;;  %s1247_s30 = smov 113   ;;  %1129 = vset.pattern.permute.xlu0 %v1249_v10  ;;  %1240 = vset.pattern.permute.xlu1 %v1249_v10  ;;  %v52_v11 = vld [vmem:[%s1691_s2] sm:$0xff]  ;;  %v1356_v13 = vand.u32 127, %v20_v12 }
   0x3   :  { %v1019_v6 = vpack.i.bf16 %v1303_v5, %v1295_v2  ;;  %v1079_v8 = vpack.i.bf16 %v1241_v3, %v1303_v5  ;;  %s1248_s6 = smov 112   ;;  %s1250_s7 = smov 111   ;;  %vm1251_vm3 = vmmov 1   ;;  %vm107_vm6 = vcmask 7168  }
   0x4   :  { %1030 = vrot.lane.b32.xlu1 %v1029_v4, %s1242_s26  ;;  %v22_v14 = vadd.s32 128, %v1356_v13  ;;  %v27_v27 = vand.u32 15, %v1356_v13  ;;  %vm94_vm7 = vcmask 121856   ;;  %vm126_vm12 = vcmask 1039360  }
   0x5   :  { %1020 = vrot.lane.b32.xlu0 %v1019_v6, %s1242_s26 }
   0x6   :  { %v34_v16 = vand.u32 15, %v22_v14  ;;  %vm1375_vm5 = vcmp.ge.s32.totalorder %v27_v27, 1  ;;  %vm1416_vm11 = vcmp.lt.s32.totalorder %v27_v27, 15 }
   0x7   :  { %vm1389_vm8 = vmpackc.low %vm1251_vm3, %vm1375_vm5 }
   0x8   :  { %1035 = vrot.lane.b32.xlu1 %v1029_v4, %s1243_s27  ;;  %vm1359_vm2 = vcmp.ge.s32.totalorder %v34_v16, 1  ;;  %vm1394_vm9 = vcmp.lt.s32.totalorder %v34_v16, 15  ;;  %vm1430_vm13 = vmpackc.low %vm1375_vm5, %vm1416_vm11  ;;  %vm176_vm5 = vcmask 916480  }
   0x9   :  { %1025 = vrot.lane.b32.xlu0 %v1019_v6, %s1243_s27  ;;  %vm1367_vm4 = vmpackc.low %vm1251_vm3, %vm1359_vm2 }
   0xa   :  { %vm1408_vm10 = vmpackc.low %vm1359_vm2, %vm1394_vm9  ;;  %vm1696_vm2 = vcmask 924672  }
   0xb   :  { %vm1442_vm14 = vmpackc.low %vm1394_vm9, %vm1251_vm3 }
   0xc   :  { %1045 = vrot.lane.b32.xlu1 %v1241_v3, %s1243_s27  ;;  %vm1458_vm15 = vmpackc.low %vm1416_vm11, %vm1251_vm3  ;;  %vm152_vm3 = vcmask 908288  }
   0xd   :  { %1040 = vrot.lane.b32.xlu0 %v1241_v3, %s1242_s26 }
  0x10   :  { %1055 = vrot.lane.b32.xlu1 %v1019_v6, %s1244_s0 }
  0x11   :  { %1050 = vrot.lane.b32.xlu0 %v1019_v6, %s1245_s28 }
  0x14   :  { %1065 = vrot.lane.b32.xlu1 %v1029_v4, %s1244_s0 }
  0x15   :  { %1060 = vrot.lane.b32.xlu0 %v1029_v4, %s1245_s28 }
  0x18   :  { %1075 = vrot.lane.b32.xlu1 %v1241_v3, %s1244_s0 }
  0x19   :  { %1070 = vrot.lane.b32.xlu0 %v1241_v3, %s1245_s28 }
  0x1c   :  { %1085 = vrot.lane.b32.xlu1 %v1084_v7, %s1246_s29 }
  0x1d   :  { %1080 = vrot.lane.b32.xlu0 %v1079_v8, %s1246_s29 }
  0x20   :  { %1095 = vrot.lane.b32.xlu1 %v1079_v8, %s1247_s30 }
  0x21   :  { %1090 = vrot.lane.b32.xlu0 %v1089_v9, %s1246_s29 }
  0x24   :  { %1105 = vrot.lane.b32.xlu1 %v1084_v7, %s1247_s30 }
  0x25   :  { %1100 = vrot.lane.b32.xlu0 %v1079_v8, %s1248_s6 }
  0x28   :  { %1115 = vrot.lane.b32.xlu1 %v1089_v9, %s1247_s30 }
  0x29   :  { %1110 = vrot.lane.b32.xlu0 %v1084_v7, %s1248_s6 }
  0x2c   :  { %148 = vrot.lane.b32.xlu1 %v1303_v5, %s1250_s7 }
  0x2d   :  { %1120 = vrot.lane.b32.xlu0 %v1089_v9, %s1248_s6 }
  0x30   :  { %260 = vrot.lane.b32.xlu1 %v1290_v1, %s1250_s7 }
  0x31   :  { %1125 = vrot.lane.b32.xlu0 %v1241_v3, %s1250_s7 }
  0x34   :  { %258 = vrot.lane.b32.xlu1 %v1285_v0, %s1250_s7 }
  0x35   :  { %146 = vrot.lane.b32.xlu0 %v1295_v2, %s1250_s7 }
  0x38   :  { %1136 = vrot.lane.b32.xlu1 %v1241_v3, %s1243_s27 }
  0x39   :  { %292 = vperm.xlu0 %1129, %v52_v11  }
  0x3c   :  { %1146 = vrot.lane.b32.xlu1 %v1241_v3, %s1244_s0 }
  0x3d   :  { %1131 = vrot.lane.b32.xlu0 %v1241_v3, %s1242_s26 }
  0x41   :  { %1141 = vrot.lane.b32.xlu0 %v1241_v3, %s1245_s28 }
  0x76   :  { %v1031_v15 = vpop.permute.xlu1 %1030 }
  0x77   :  { %v1021_v17 = vpop.permute.xlu0 %1020  ;;  %v1033_v18 = vunpack.i.h.bf16 %v1031_v15  ;;  %v1032_v19 = vunpack.i.l.bf16 %v1031_v15 }
  0x78   :  { %v1023_v20 = vunpack.i.h.bf16 %v1021_v17  ;;  %v1022_v21 = vunpack.i.l.bf16 %v1021_v17 }
  0x79   :  { %v199_v31 = vsel %vm75_vm0, %v1032_v19, %v1033_v18 }
  0x7a   :  { %v1036_v22 = vpop.permute.xlu1 %1035  ;;  %v77_v34 = vsel %vm75_vm0, %v1022_v21, %v1023_v20 }
  0x7b   :  { %v1038_v24 = vunpack.i.h.bf16 %v1036_v22  ;;  %v1037_v25 = vunpack.i.l.bf16 %v1036_v22  ;;  %v1026_v26 = vpop.permute.xlu0 %1025 }
  0x7c   :  { %v1028_v28 = vunpack.i.h.bf16 %v1026_v26  ;;  %v1027_v29 = vunpack.i.l.bf16 %v1026_v26 }
  0x7d   :  { %v277_v32 = vsel %vm165_vm1, %v1037_v25, %v1038_v24 }
  0x7e   :  { %v1046_v33 = vpop.permute.xlu1 %1045  ;;  %v167_v35 = vsel %vm165_vm1, %v1027_v29, %v1028_v28  ;;  %v936_v36 = vpack.c.bf16 %v277_v32, %v199_v31 }
  0x7f   :  { %v1048_v37 = vunpack.i.h.bf16 %v1046_v33  ;;  %v1047_v38 = vunpack.i.l.bf16 %v1046_v33  ;;  %v1041_v39 = vpop.permute.xlu0 %1040  ;;  %v912_v40 = vpack.c.bf16 %v167_v35, %v77_v34 }
  0x80   :  { %v1043_v42 = vunpack.i.h.bf16 %v1041_v39  ;;  %v1042_v43 = vunpack.i.l.bf16 %v1041_v39  ;;  %938 = vmatprep.subr.msk.bf16.mxu1 %vm1367_vm4, %v936_v36 }
  0x81   :  { %914 = vmatprep.subr.msk.bf16.mxu0 %vm1367_vm4, %v912_v40  ;;  %v166_v44 = vsel %vm165_vm1, %v1047_v38, %v1027_v29  ;;  %v276_v45 = vsel %vm165_vm1, %v1048_v37, %v1037_v25 }
  0x82   :  { %v1056_v46 = vpop.permute.xlu1 %1055  ;;  %v76_v47 = vsel %vm75_vm0, %v1042_v43, %v1022_v21  ;;  %v198_v49 = vsel %vm75_vm0, %v1043_v42, %v1032_v19 }
  0x83   :  { %v1058_v51 = vunpack.i.h.bf16 %v1056_v46  ;;  %v1057_v52 = vunpack.i.l.bf16 %v1056_v46  ;;  %v1051_v53 = vpop.permute.xlu0 %1050  ;;  %v915_v54 = vpack.c.bf16 %v166_v44, %v76_v47  ;;  %v939_v55 = vpack.c.bf16 %v276_v45, %v198_v49 }
  0x84   :  { %v1053_v56 = vunpack.i.h.bf16 %v1051_v53  ;;  %v1052_v57 = vunpack.i.l.bf16 %v1051_v53 }
  0x85   :  { %v109_v58 = vsel %vm107_vm6, %v1057_v52, %v1058_v51  ;;  %917 = vmatpush1.bf16.msk.msra.mxu0 %vm1389_vm8, %v915_v54  ;;  %941 = vmatpush1.bf16.msk.msra.mxu1 %vm1389_vm8, %v939_v55 }
  0x86   :  { %v96_v59 = vsel %vm94_vm7, %v1052_v57, %v1053_v56  ;;  %v1066_v60 = vpop.permute.xlu1 %1065 }
  0x87   :  { %v918_v62 = vpack.c.bf16 %v109_v58, %v96_v59  ;;  %v1068_v63 = vunpack.i.h.bf16 %v1066_v60  ;;  %v1067_v4 = vunpack.i.l.bf16 %v1066_v60  ;;  %v1061_v6 = vpop.permute.xlu0 %1060 }
  0x88   :  { %v1063_v7 = vunpack.i.h.bf16 %v1061_v6  ;;  %v1062_v8 = vunpack.i.l.bf16 %v1061_v6 }
  0x89   :  { %v223_v9 = vsel %vm107_vm6, %v1067_v4, %v1068_v63  ;;  %920 = vmatprep.subr.msk.bf16.mxu0 %vm1408_vm10, %v918_v62 }
  0x8a   :  { %v211_v10 = vsel %vm94_vm7, %v1062_v8, %v1063_v7  ;;  %v1076_v11 = vpop.permute.xlu1 %1075 }
  0x8b   :  { %v942_v12 = vpack.c.bf16 %v223_v9, %v211_v10  ;;  %v1078_v13 = vunpack.i.h.bf16 %v1076_v11  ;;  %v1077_v14 = vunpack.i.l.bf16 %v1076_v11  ;;  %v1071_v15 = vpop.permute.xlu0 %1070 }
  0x8c   :  { %v1073_v17 = vunpack.i.h.bf16 %v1071_v15  ;;  %v1072_v18 = vunpack.i.l.bf16 %v1071_v15 }
  0x8d   :  { %v108_v19 = vsel %vm107_vm6, %v1077_v14, %v1057_v52  ;;  %v222_v20 = vsel %vm107_vm6, %v1078_v13, %v1067_v4  ;;  %944 = vmatprep.subr.msk.bf16.mxu1 %vm1408_vm10, %v942_v12 }
  0x8e   :  { %v95_v21 = vsel %vm94_vm7, %v1072_v18, %v1052_v57  ;;  %v210_v22 = vsel %vm94_vm7, %v1073_v17, %v1062_v8  ;;  %v1086_v23 = vpop.permute.xlu1 %1085 }
  0x8f   :  { %v921_v25 = vpack.c.bf16 %v108_v19, %v95_v21  ;;  %v945_v26 = vpack.c.bf16 %v222_v20, %v210_v22  ;;  %v1088_v27 = vunpack.i.h.bf16 %v1086_v23  ;;  %v1087_v28 = vunpack.i.l.bf16 %v1086_v23  ;;  %v1081_v29 = vpop.permute.xlu0 %1080 }
  0x90   :  { %v1083_v31 = vunpack.i.h.bf16 %v1081_v29  ;;  %v1082_v32 = vunpack.i.l.bf16 %v1081_v29 }
  0x91   :  { %v241_v33 = vsel %vm126_vm12, %v1087_v28, %v1088_v27  ;;  %923 = vmatpush1.bf16.msk.msra.mxu0 %vm1430_vm13, %v921_v25  ;;  %947 = vmatpush1.bf16.msk.msra.mxu1 %vm1430_vm13, %v945_v26 }
  0x92   :  { %v948_v35 = vpack.c.bf16 %v241_v33, %v1290_v1  ;;  %v128_v36 = vsel %vm126_vm12, %v1082_v32, %v1083_v31  ;;  %v1096_v37 = vpop.permute.xlu1 %1095 }
  0x93   :  { %v924_v38 = vpack.c.bf16 %v128_v36, %v1303_v5  ;;  %v1091_v39 = vpop.permute.xlu0 %1090  ;;  %v1098_v42 = vunpack.i.h.bf16 %v1096_v37  ;;  %v1097_v43 = vunpack.i.l.bf16 %v1096_v37 }
  0x94   :  { %v1093_v40 = vunpack.i.h.bf16 %v1091_v39  ;;  %v1092_v41 = vunpack.i.l.bf16 %v1091_v39  ;;  %950 = vmatprep.subr.msk.bf16.mxu1 %vm1442_vm14, %v948_v35 }
  0x95   :  { %926 = vmatprep.subr.msk.bf16.mxu0 %vm1442_vm14, %v924_v38  ;;  %v141_v53 = vsel %vm1696_vm2, %v1097_v43, %v1098_v42 }
  0x96   :  { %v240_v44 = vsel %vm126_vm12, %v1093_v40, %v1087_v28  ;;  %v127_v1 = vsel %vm126_vm12, %v1092_v41, %v1082_v32  ;;  %v1106_v45 = vpop.permute.xlu1 %1105  ;;  %v51_v28 = vld [vmem:[%s1692_s1] sm:$0xff] }
  0x97   :  { %v951_v46 = vpack.c.bf16 %v240_v44, %v1285_v0  ;;  %v927_v47 = vpack.c.bf16 %v127_v1, %v1295_v2  ;;  %v1101_v49 = vpop.permute.xlu0 %1100  ;;  %v1108_v54 = vunpack.i.h.bf16 %v1106_v45  ;;  %v1107_v55 = vunpack.i.l.bf16 %v1106_v45 }
  0x98   :  { %v1103_v51 = vunpack.i.h.bf16 %v1101_v49  ;;  %v1102_v52 = vunpack.i.l.bf16 %v1101_v49 }
  0x99   :  { %929 = vmatpush1.bf16.msk.msra.mxu0 %vm1458_vm15, %v927_v47  ;;  %953 = vmatpush1.bf16.msk.msra.mxu1 %vm1458_vm15, %v951_v46  ;;  %v253_v60 = vsel %vm1696_vm2, %v1107_v55, %v1108_v54 }
  0x9a   :  { %v178_v56 = vsel %vm176_vm5, %v1102_v52, %v1103_v51  ;;  %v1116_v57 = vpop.permute.xlu1 %1115  ;;  %v447_v51 = vld [vmem:[%s1693_s4] sm:$0xff] }
  0x9b   :  { %v930_v0 = vpack.c.bf16 %v178_v56, %v141_v53  ;;  %v1111_v58 = vpop.permute.xlu0 %1110  ;;  %v1118_v62 = vunpack.i.h.bf16 %v1116_v57  ;;  %v1117_v63 = vunpack.i.l.bf16 %v1116_v57 }
  0x9c   :  { %v1113_v2 = vunpack.i.h.bf16 %v1111_v58  ;;  %v1112_v59 = vunpack.i.l.bf16 %v1111_v58 }
  0x9d   :  { %932 = vmatprep.subr.msk.bf16.mxu0 %vm1367_vm4, %v930_v0  ;;  %v140_v11 = vsel %vm1696_vm2, %v1117_v63, %v1097_v43  ;;  %v252_v12 = vsel %vm1696_vm2, %v1118_v62, %v1107_v55  ;;  %vm295_vm2 = vcmask 588800  }
  0x9e   :  { %v287_v4 = vsel %vm176_vm5, %v1112_v59, %v1113_v2  ;;  %v149_v6 = vpop.permute.xlu1 %148 }
  0x9f   :  { %v954_v7 = vpack.c.bf16 %v287_v4, %v253_v60  ;;  %v1121_v8 = vpop.permute.xlu0 %1120 }
  0xa0   :  { %v1123_v9 = vunpack.i.h.bf16 %v1121_v8  ;;  %v1122_v10 = vunpack.i.l.bf16 %v1121_v8 }
  0xa1   :  { %956 = vmatprep.subr.msk.bf16.mxu1 %vm1367_vm4, %v954_v7 }
  0xa2   :  { %v177_v13 = vsel %vm176_vm5, %v1122_v10, %v1102_v52  ;;  %v286_v14 = vsel %vm176_vm5, %v1123_v9, %v1112_v59  ;;  %v261_v15 = vpop.permute.xlu1 %260  ;;  %v448_v52 = vld [vmem:[%s1693_s4 + $0x8] sm:$0xff] }
  0xa3   :  { %v933_v17 = vpack.c.bf16 %v177_v13, %v140_v11  ;;  %v957_v18 = vpack.c.bf16 %v286_v14, %v252_v12  ;;  %v1126_v19 = vpop.permute.xlu0 %1125 }
  0xa4   :  { %v1128_v20 = vunpack.i.h.bf16 %v1126_v19  ;;  %v1127_v21 = vunpack.i.l.bf16 %v1126_v19 }
  0xa5   :  { %935 = vmatpush1.bf16.msk.msra.mxu0 %vm1389_vm8, %v933_v17  ;;  %959 = vmatpush1.bf16.msk.msra.mxu1 %vm1389_vm8, %v957_v18 }
  0xa6   :  { %v259_v22 = vpop.permute.xlu1 %258  ;;  %v154_v23 = vsel %vm152_vm3, %v149_v6, %v1127_v21  ;;  %v265_v25 = vsel %vm152_vm3, %v261_v15, %v1128_v20 }
  0xa7   :  { %v264_v26 = vsel %vm152_vm3, %v259_v22, %v261_v15  ;;  %v147_v27 = vpop.permute.xlu0 %146  ;;  %864 = vmatprep.subr.msk.mxu0 %vm1394_vm9, %v154_v23  ;;  %877 = vmatprep.subr.msk.mxu1 %vm1394_vm9, %v265_v25 }
  0xa8   :  { %v153_v29 = vsel %vm152_vm3, %v147_v27, %v149_v6 }
  0xa9   :  { %865 = vmatpush1.msk.msra.mxu0 %vm1416_vm11, %v153_v29  ;;  %878 = vmatpush1.msk.msra.mxu1 %vm1416_vm11, %v264_v26 }
  0xaa   :  { %866 = vmatmul.mubr.msk.f32.vlgmr.msra.gmra.mrb[0].mxu0 %vm295_vm2, %v51_v28  ;;  %879 = vmatmul.mubr.msk.f32.vlgmr.msra.gmra.mrb[0].mxu1 %vm295_vm2, %v51_v28  ;;  %v1137_v53 = vpop.permute.xlu1 %1136 }
  0xab   :  { %741 = vmatprep.mubr.f32.mxu0 %v1241_v3  ;;  %818 = vmatprep.mubr.f32.mxu1 %v1241_v3  ;;  %v1138_v4 = vunpack.i.l.bf16 %v1137_v53  ;;  %v1139_v21 = vunpack.i.h.bf16 %v1137_v53 }
  0xae   :  { %v1558_v55 = vpop.permute.xlu1 %1146 }
  0xb8   :  { %v293_v31 = vpop.permute.xlu0 %292 }
  0xbc   :  { %v1132_v54 = vpop.permute.xlu0 %1131 }
  0xbd   :  { %v1133_v6 = vunpack.i.l.bf16 %v1132_v54  ;;  %v1134_v15 = vunpack.i.h.bf16 %v1132_v54 }
  0xc0   :  { %v1560_v56 = vpop.permute.xlu0 %1141 }
  0xc1   :  { %v1144_v53 = vunpack.i.h.bf16 %v1560_v56 }
 0x17d   :  { %v365_v32 = vpop.f32.mrb[0].mxu0  ;;  %v436_v33 = vpop.f32.mrb[0].mxu1 }
 0x17e   :  { %v366_v35 = vadd.f32 %v365_v32, %v293_v31  ;;  %v437_v36 = vadd.f32 %v436_v33, %v293_v31  ;;  %v367_v37 = vpop.f32.mrb[1].mxu0  ;;  %v438_v38 = vpop.f32.mrb[1].mxu1 }
 0x17f   :  { %v368_v39 = vadd.f32 %v367_v37, %v293_v31  ;;  %v439_v43 = vadd.f32 %v438_v38, %v293_v31  ;;  %v1148_v37 = vunpack.i.l.bf16 %v1558_v55  ;;  %v1143_v38 = vunpack.i.l.bf16 %v1560_v56 }
 0x180   :  { %v1507_v40 = vmax.f32 %v366_v35, 0.0  ;;  %v1509_v41 = vmax.f32 %v437_v36, 0.0 }
 0x181   :  { %v1511_v42 = vmax.f32 %v368_v39, 0.0  ;;  %v1517_v1 = vmax.f32 %v439_v43, 0.0 }
 0x182   :  { %v1155_v44 = vpack.i.bf16 %v1509_v41, %v1507_v40 }
 0x183   :  { %v1165_v45 = vpack.i.bf16 %v1511_v42, %v1507_v40  ;;  %v1175_v46 = vpack.i.bf16 %v1517_v1, %v1509_v41  ;;  %v1205_v47 = vpack.i.bf16 %v1241_v3, %v1511_v42  ;;  %v1210_v49 = vpack.i.bf16 %v1241_v3, %v1517_v1 }
 0x184   :  { %1156 = vrot.lane.b32.xlu1 %v1155_v44, %s1247_s30  ;;  %1151 = vrot.lane.b32.xlu0 %v1155_v44, %s1246_s29 }
 0x188   :  { %1166 = vrot.lane.b32.xlu1 %v1165_v45, %s1242_s26  ;;  %1161 = vrot.lane.b32.xlu0 %v1155_v44, %s1248_s6  ;;  %v1149_v44 = vunpack.i.h.bf16 %v1558_v55 }
 0x18c   :  { %1171 = vrot.lane.b32.xlu1 %v1165_v45, %s1243_s27  ;;  %1176 = vrot.lane.b32.xlu0 %v1175_v46, %s1242_s26 }
 0x190   :  { %1181 = vrot.lane.b32.xlu1 %v1175_v46, %s1243_s27  ;;  %1186 = vrot.lane.b32.xlu0 %v1165_v45, %s1245_s28 }
 0x194   :  { %1191 = vrot.lane.b32.xlu1 %v1165_v45, %s1244_s0  ;;  %1196 = vrot.lane.b32.xlu0 %v1175_v46, %s1245_s28 }
 0x198   :  { %1201 = vrot.lane.b32.xlu1 %v1175_v46, %s1244_s0  ;;  %1206 = vrot.lane.b32.xlu0 %v1205_v47, %s1246_s29 }
 0x19c   :  { %1211 = vrot.lane.b32.xlu1 %v1210_v49, %s1246_s29  ;;  %1221 = vrot.lane.b32.xlu0 %v1205_v47, %s1248_s6 }
 0x1a0   :  { %1216 = vrot.lane.b32.xlu1 %v1205_v47, %s1247_s30  ;;  %1231 = vrot.lane.b32.xlu0 %v1210_v49, %s1248_s6 }
 0x1a4   :  { %1226 = vrot.lane.b32.xlu1 %v1210_v49, %s1247_s30  ;;  %1236 = vrot.lane.b32.xlu0 %v1241_v3, %s1250_s7 }
 0x1a8   :  { %525 = vrot.lane.b32.xlu1 %v1511_v42, %s1250_s7  ;;  %523 = vrot.lane.b32.xlu0 %v1507_v40, %s1250_s7 }
 0x1ac   :  { %631 = vrot.lane.b32.xlu1 %v1517_v1, %s1250_s7  ;;  %663 = vperm.xlu0 %1129, %v447_v51  }
 0x1b0   :  { %629 = vrot.lane.b32.xlu1 %v1509_v41, %s1250_s7 }
 0x1b4   :  { %668 = vperm.xlu1 %1240, %v448_v52  }
 0x1f6   :  { %v1562_v57 = vpop.permute.xlu1 %1156  ;;  %v1564_v0 = vpop.permute.xlu0 %1151 }
 0x1f7   :  { %v1153_v54 = vunpack.i.l.bf16 %v1564_v0  ;;  %v1158_v61 = vunpack.i.l.bf16 %v1562_v57 }
 0x1fa   :  { %v1167_v58 = vpop.permute.xlu1 %1166  ;;  %v1566_v2 = vpop.permute.xlu0 %1161 }
 0x1fb   :  { %v1169_v59 = vunpack.i.h.bf16 %v1167_v58  ;;  %v1168_v60 = vunpack.i.l.bf16 %v1167_v58 }
 0x1fd   :  { %v463_v11 = vsel %vm75_vm0, %v1133_v6, %v1168_v60  ;;  %v464_v12 = vsel %vm75_vm0, %v1168_v60, %v1169_v59 }
 0x1fe   :  { %v1172_v62 = vpop.permute.xlu1 %1171  ;;  %v1177_v63 = vpop.permute.xlu0 %1176 }
 0x1ff   :  { %v1174_v7 = vunpack.i.h.bf16 %v1172_v62  ;;  %v1173_v8 = vunpack.i.l.bf16 %v1172_v62  ;;  %v1179_v9 = vunpack.i.h.bf16 %v1177_v63  ;;  %v1178_v10 = vunpack.i.l.bf16 %v1177_v63 }
 0x201   :  { %v541_v13 = vsel %vm165_vm1, %v1138_v4, %v1173_v8  ;;  %v542_v14 = vsel %vm165_vm1, %v1173_v8, %v1174_v7  ;;  %v569_v25 = vsel %vm75_vm0, %v1134_v15, %v1178_v10  ;;  %v570_v26 = vsel %vm75_vm0, %v1178_v10, %v1179_v9 }
 0x202   :  { %v960_v17 = vpack.c.bf16 %v542_v14, %v464_v12  ;;  %v963_v18 = vpack.c.bf16 %v541_v13, %v463_v11  ;;  %v1182_v19 = vpop.permute.xlu1 %1181  ;;  %v1187_v20 = vpop.permute.xlu0 %1186  ;;  %vm1717_vm0 = vcmask 924672  }
 0x203   :  { %v1184_v22 = vunpack.i.h.bf16 %v1182_v19  ;;  %v1183_v23 = vunpack.i.l.bf16 %v1182_v19  ;;  %v1189_v29 = vunpack.i.h.bf16 %v1187_v20  ;;  %v1188_v31 = vunpack.i.l.bf16 %v1187_v20 }
 0x204   :  { %962 = vmatprep.subr.msk.bf16.mxu0 %vm1367_vm4, %v960_v17  ;;  %v1154_v19 = vunpack.i.h.bf16 %v1564_v0 }
 0x205   :  { %v647_v27 = vsel %vm165_vm1, %v1139_v21, %v1183_v23  ;;  %v648_v28 = vsel %vm165_vm1, %v1183_v23, %v1184_v22  ;;  %965 = vmatpush1.bf16.msk.msra.mxu0 %vm1389_vm8, %v963_v18  ;;  %v475_v47 = vsel %vm94_vm7, %v1143_v38, %v1188_v31  ;;  %v476_v49 = vsel %vm94_vm7, %v1188_v31, %v1189_v29  ;;  %vm1718_vm1 = vmmov %vm1717_vm0 }
 0x206   :  { %v984_v32 = vpack.c.bf16 %v648_v28, %v570_v26  ;;  %v987_v33 = vpack.c.bf16 %v647_v27, %v569_v25  ;;  %v1192_v35 = vpop.permute.xlu1 %1191  ;;  %v1197_v36 = vpop.permute.xlu0 %1196 }
 0x207   :  { %v1194_v39 = vunpack.i.h.bf16 %v1192_v35  ;;  %v1193_v43 = vunpack.i.l.bf16 %v1192_v35  ;;  %v1199_v45 = vunpack.i.h.bf16 %v1197_v36  ;;  %v1198_v46 = vunpack.i.l.bf16 %v1197_v36 }
 0x208   :  { %986 = vmatprep.subr.msk.bf16.mxu1 %vm1367_vm4, %v984_v32  ;;  %v1159_v36 = vunpack.i.h.bf16 %v1562_v57 }
 0x209   :  { %v487_v51 = vsel %vm107_vm6, %v1148_v37, %v1193_v43  ;;  %v488_v52 = vsel %vm107_vm6, %v1193_v43, %v1194_v39  ;;  %989 = vmatpush1.bf16.msk.msra.mxu1 %vm1389_vm8, %v987_v33  ;;  %v581_v7 = vsel %vm94_vm7, %v1144_v53, %v1198_v46  ;;  %v582_v8 = vsel %vm94_vm7, %v1198_v46, %v1199_v45  ;;  %vm1720_vm7 = vmmov %vm1717_vm0 }
 0x20a   :  { %v966_v55 = vpack.c.bf16 %v488_v52, %v476_v49  ;;  %v969_v58 = vpack.c.bf16 %v487_v51, %v475_v47  ;;  %v1202_v59 = vpop.permute.xlu1 %1201  ;;  %v1207_v60 = vpop.permute.xlu0 %1206 }
 0x20b   :  { %v1204_v62 = vunpack.i.h.bf16 %v1202_v59  ;;  %v1203_v63 = vunpack.i.l.bf16 %v1202_v59  ;;  %v1209_v4 = vunpack.i.h.bf16 %v1207_v60  ;;  %v1208_v6 = vunpack.i.l.bf16 %v1207_v60  ;;  %v445_v59 = vld [vmem:[%s1694_s3] sm:$0xff] }
 0x20c   :  { %968 = vmatprep.subr.msk.bf16.mxu0 %vm1408_vm10, %v966_v55 }
 0x20d   :  { %v593_v9 = vsel %vm107_vm6, %v1149_v44, %v1203_v63  ;;  %v594_v56 = vsel %vm107_vm6, %v1203_v63, %v1204_v62  ;;  %v505_v10 = vsel %vm126_vm12, %v1153_v54, %v1208_v6  ;;  %v506_v11 = vsel %vm126_vm12, %v1208_v6, %v1209_v4  ;;  %971 = vmatpush1.bf16.msk.msra.mxu0 %vm1430_vm13, %v969_v58  ;;  %vm1719_vm6 = vmmov %vm1717_vm0  ;;  %v446_v63 = vld [vmem:[%s1694_s3 + $0x8] sm:$0xff] }
 0x20e   :  { %v990_v12 = vpack.c.bf16 %v594_v56, %v582_v8  ;;  %v993_v13 = vpack.c.bf16 %v593_v9, %v581_v7  ;;  %v972_v14 = vpack.c.bf16 %v506_v11, %v1511_v42  ;;  %v975_v15 = vpack.c.bf16 %v505_v10, %v1507_v40  ;;  %v1212_v17 = vpop.permute.xlu1 %1211  ;;  %v1222_v18 = vpop.permute.xlu0 %1221 }
 0x20f   :  { %v1214_v20 = vunpack.i.h.bf16 %v1212_v17  ;;  %v1213_v21 = vunpack.i.l.bf16 %v1212_v17  ;;  %v1224_v22 = vunpack.i.h.bf16 %v1222_v18  ;;  %v1223_v23 = vunpack.i.l.bf16 %v1222_v18 }
 0x210   :  { %974 = vmatprep.subr.msk.bf16.mxu0 %vm1442_vm14, %v972_v14  ;;  %992 = vmatprep.subr.msk.bf16.mxu1 %vm1408_vm10, %v990_v12  ;;  %v1163_v40 = vunpack.i.l.bf16 %v1566_v2  ;;  %v1164_v44 = vunpack.i.h.bf16 %v1566_v2 }
 0x211   :  { %v611_v25 = vsel %vm126_vm12, %v1154_v19, %v1213_v21  ;;  %v612_v42 = vsel %vm126_vm12, %v1213_v21, %v1214_v20  ;;  %977 = vmatpush1.bf16.msk.msra.mxu0 %vm1458_vm15, %v975_v15  ;;  %995 = vmatpush1.bf16.msk.msra.mxu1 %vm1430_vm13, %v993_v13  ;;  %v552_v33 = vsel %vm176_vm5, %v1223_v23, %v1224_v22 }
 0x212   :  { %v996_v0 = vpack.c.bf16 %v612_v42, %v1517_v1  ;;  %v999_v26 = vpack.c.bf16 %v611_v25, %v1509_v41  ;;  %v1217_v27 = vpop.permute.xlu1 %1216  ;;  %v1232_v28 = vpop.permute.xlu0 %1231  ;;  %v551_v32 = vsel %vm176_vm5, %v1163_v40, %v1223_v23 }
 0x213   :  { %v1219_v29 = vunpack.i.h.bf16 %v1217_v27  ;;  %v1218_v31 = vunpack.i.l.bf16 %v1217_v27  ;;  %v1234_v35 = vunpack.i.h.bf16 %v1232_v28  ;;  %v1233_v24 = vunpack.i.l.bf16 %v1232_v28 }
 0x214   :  { %998 = vmatprep.subr.msk.bf16.mxu1 %vm1442_vm14, %v996_v0 }
 0x215   :  { %v517_v1 = vsel %vm1717_vm0, %v1158_v61, %v1218_v31  ;;  %v518_v41 = vsel %vm1718_vm1, %v1218_v31, %v1219_v29  ;;  %1001 = vmatpush1.bf16.msk.msra.mxu1 %vm1458_vm15, %v999_v26  ;;  %v657_v47 = vsel %vm176_vm5, %v1164_v44, %v1233_v24  ;;  %v658_v49 = vsel %vm176_vm5, %v1233_v24, %v1234_v35 }
 0x216   :  { %v978_v37 = vpack.c.bf16 %v552_v33, %v518_v41  ;;  %v981_v38 = vpack.c.bf16 %v551_v32, %v517_v1  ;;  %v1227_v39 = vpop.permute.xlu1 %1226  ;;  %v1237_v43 = vpop.permute.xlu0 %1236 }
 0x217   :  { %v1229_v45 = vunpack.i.h.bf16 %v1227_v39  ;;  %v1228_v34 = vunpack.i.l.bf16 %v1227_v39  ;;  %v1238_v46 = vunpack.i.l.bf16 %v1237_v43  ;;  %v1239_v54 = vunpack.i.h.bf16 %v1237_v43 }
 0x218   :  { %980 = vmatprep.subr.msk.bf16.mxu0 %vm1367_vm4, %v978_v37 }
 0x219   :  { %v623_v57 = vsel %vm1719_vm6, %v1159_v36, %v1228_v34  ;;  %v624_v51 = vsel %vm1720_vm7, %v1228_v34, %v1229_v45  ;;  %983 = vmatpush1.bf16.msk.msra.mxu0 %vm1389_vm8, %v981_v38 }
 0x21a   :  { %v1002_v5 = vpack.c.bf16 %v658_v49, %v624_v51  ;;  %v1005_v52 = vpack.c.bf16 %v657_v47, %v623_v57  ;;  %v526_v2 = vpop.permute.xlu1 %525  ;;  %v524_v53 = vpop.permute.xlu0 %523 }
 0x21b   :  { %v530_v55 = vsel %vm152_vm3, %v526_v2, %v1238_v46  ;;  %v529_v58 = vsel %vm152_vm3, %v524_v53, %v526_v2 }
 0x21c   :  { %890 = vmatprep.subr.msk.mxu0 %vm1394_vm9, %v530_v55  ;;  %1004 = vmatprep.subr.msk.bf16.mxu1 %vm1367_vm4, %v1002_v5 }
 0x21d   :  { %891 = vmatpush1.msk.msra.mxu0 %vm1416_vm11, %v529_v58  ;;  %1007 = vmatpush1.bf16.msk.msra.mxu1 %vm1389_vm8, %v1005_v52 }
 0x21e   :  { %v632_v60 = vpop.permute.xlu1 %631  ;;  %892 = vmatmul.mubr.msk.f32.vlgmr.msra.gmra.mrb[2].mxu0 %vm295_vm2, %v445_v59 }
 0x21f   :  { %v636_v62 = vsel %vm152_vm3, %v632_v60, %v1239_v54  ;;  %747 = vmatprep.mubr.f32.mxu0 %v1241_v3 }
 0x220   :  { %904 = vmatprep.subr.msk.mxu1 %vm1394_vm9, %v636_v62 }
 0x222   :  { %v630_v30 = vpop.permute.xlu1 %629  ;;  %893 = vmatmul.mubr.msk.f32.gmra.mrb[4].mxu0 %vm295_vm2, %v446_v63 }
 0x223   :  { %v635_v48 = vsel %vm152_vm3, %v630_v30, %v632_v60 }
 0x224   :  { %905 = vmatpush1.msk.msra.mxu1 %vm1416_vm11, %v635_v48 }
 0x225   :  { %906 = vmatmul.mubr.msk.f32.vlgmr.msra.gmra.mrb[2].mxu1 %vm295_vm2, %v445_v59 }
 0x226   :  { %824 = vmatprep.mubr.f32.mxu1 %v1241_v3 }
 0x229   :  { %907 = vmatmul.mubr.msk.f32.gmra.mrb[4].mxu1 %vm295_vm2, %v446_v63 }
 0x22b   :  { %v664_v4 = vpop.permute.xlu0 %663 }
 0x233   :  { %v669_v9 = vpop.permute.xlu1 %668 }
 0x2f1   :  { %v743_v6 = vpop.f32.mrb[2].mxu0 }
 0x2f2   :  { %v744_v7 = vadd.f32 %v743_v6, %v664_v4  ;;  %v745_v8 = vpop.f32.mrb[3].mxu0 }
 0x2f3   :  { %v746_v50 = vadd.f32 %v745_v8, %v664_v4 }
 0x2f4   :  { %v831_v56 = vmax.f32 %v744_v7, 0.0 }
 0x2f5   :  { %v832_v10 = vmax.f32 %v746_v50, 0.0  ;;  %v749_v11 = vpop.f32.mrb[4].mxu0 }
 0x2f6   :  { %839 = vst [vmem:[%s1695_s5] sm:$0xff] %v831_v56  ;;  %v750_v16 = vadd.f32 %v749_v11, %v669_v9  ;;  %v751_v12 = vpop.f32.mrb[5].mxu0 }
 0x2f7   :  { %840 = vst [vmem:[%s1695_s5 + $0x8] sm:$0xff] %v832_v10  ;;  %v752_v3 = vadd.f32 %v751_v12, %v669_v9 }
 0x2f8   :  { %v820_v13 = vpop.f32.mrb[2].mxu1  ;;  %v835_v14 = vmax.f32 %v750_v16, 0.0 }
 0x2f9   :  { %v821_v15 = vadd.f32 %v820_v13, %v664_v4  ;;  %v822_v17 = vpop.f32.mrb[3].mxu1  ;;  %v836_v18 = vmax.f32 %v752_v3, 0.0 }
 0x2fa   :  { %v823_v19 = vadd.f32 %v822_v17, %v664_v4  ;;  %841 = vst [vmem:[%s1695_s5 + $0x10] sm:$0xff] %v835_v14 }
 0x2fb   :  { %v833_v20 = vmax.f32 %v821_v15, 0.0  ;;  %842 = vst [vmem:[%s1695_s5 + $0x18] sm:$0xff] %v836_v18 }
 0x2fc   :  { %v834_v21 = vmax.f32 %v823_v19, 0.0  ;;  %v826_v22 = vpop.f32.mrb[4].mxu1 }
 0x2fd   :  { %908 = vst [vmem:[%s1695_s5 + $0x20] sm:$0xff] %v833_v20  ;;  %v827_v23 = vadd.f32 %v826_v22, %v669_v9  ;;  %v828_v25 = vpop.f32.mrb[5].mxu1 }
 0x2fe   :  { %909 = vst [vmem:[%s1695_s5 + $0x28] sm:$0xff] %v834_v21  ;;  %v829_v42 = vadd.f32 %v828_v25, %v669_v9 }
 0x2ff   :  { %v837_v40 = vmax.f32 %v827_v23, 0.0 }
 0x300   :  { %v838_v0 = vmax.f32 %v829_v42, 0.0 }
 0x301   :  { %910 = vst [vmem:[%s1695_s5 + $0x30] sm:$0xff] %v837_v40 }
 0x302   :  { %911 = vst [vmem:[%s1695_s5 + $0x38] sm:$0xff] %v838_v0 }

</bundles_post_ra>
